<compile_context>
chip_gen: v7x
topology: tpu7x:2x2x1
jax: 0.10.0
libtpu: 0.0.40
codegen_flags: <defaults>
</compile_context>

<pallas_src>
import functools

import jax
import jax.numpy as jnp
from jax.experimental import pallas as pl
from jax.experimental.pallas import tpu as pltpu


def _linear_eta_kernel(side_ref, emb_ref, wrow_ref, smap_ref, b_ref,
                       mape_ref, mae_ref, *, batch_size):
    bt = emb_ref.shape[0]

    emb = emb_ref[...].astype(jnp.float32)           # (bt, S*D) exact f32 upcast
    tt = side_ref[:, 0:1]                            # (bt, 1) travel time
    ln = side_ref[:, 1:2]                            # (bt, 1) valid-token count

    # Fused masked pooling + Linear(D->1):
    #   coeff[b, s*D + d] = w[d] if s < len[b] else 0
    coeff = jnp.where(smap_ref[...] < ln, wrow_ref[...], 0.0)          # (bt, S*D)
    eta = jnp.sum(emb * coeff, axis=1, keepdims=True) + b_ref[0, 0]    # (bt, 1)

    diff = jnp.abs(eta - tt)

    # Mask padded remainder rows of the last tile (select, never multiply,
    # so garbage/NaN from OOB block reads cannot propagate into the sums).
    row = pl.program_id(0) * bt + jax.lax.broadcasted_iota(jnp.int32, (bt, 1), 0)
    valid = row < batch_size
    mape_part = jnp.sum(jnp.where(valid, diff / (tt + 1e-9), 0.0))
    mae_part = jnp.sum(jnp.where(valid, diff, 0.0))

    # (1, 8, 128) per-tile scalar outputs keep the stored block (8,128)-aligned
    # (no masked partial stores); the wrapper reads element [i, 0, 0].
    mape_ref[...] = jnp.full(mape_ref.shape, mape_part, jnp.float32)
    mae_ref[...] = jnp.full(mae_ref.shape, mae_part, jnp.float32)


def _pick_tile(B, SD, emb_itemsize, tile_b):
    """Pick the batch-tile rows from padded VMEM bytes (per perf review)."""
    sd_pad = ((SD + 127) // 128) * 128
    emb_row = sd_pad * emb_itemsize           # per buffer, per row (lane-dense)
    side_row = 128 * 4                        # (bt, 2) f32 pads to 128 lanes
    inter_row = 2 * sd_pad * 4                # in-kernel f32 intermediates
    per_row = 2 * (emb_row + side_row) + inter_row
    fixed = (2 * 2 * 8 * sd_pad * 4           # w_row + s_map broadcast blocks
             + 2 * 2 * 8 * 128 * 4            # the two tiny output blocks
             + (1 << 20))                     # compiler scratch slack

    try:
        phys = pltpu.get_tpu_info().vmem_capacity_bytes
    except Exception:
        phys = 64 * 1024 * 1024               # conservative: v7x per-TC VMEM

    if tile_b is not None:
        bt = max(1, min(int(tile_b), B))
    else:
        budget = int(phys * 0.55)
        rows = max(32, ((budget - fixed) // per_row) // 32 * 32)
        if rows >= B:
            if B < 256:
                bt = B
            else:
                # Whole batch fits; still split into >=2 tiles so both v7x
                # TensorCores ("parallel" grid axis) get work.
                bt = ((-(-B // 2) + 31) // 32) * 32
        else:
            bt = int(rows)

    need = fixed + bt * per_row
    vmem_limit = int(max(32 << 20, min(int(phys * 0.80), need + (8 << 20))))
    return bt, vmem_limit


def linear_eta_forward(token_emb, padding_masks, w, b, travel_time, *, tile_b=None):
    """token_emb: (B,S,D) f32/bf16 (kept in native dtype, streamed flattened),
       padding_masks: (B,S) bool/float prefix masks, w: (D,1) f32,
       b: scalar/(1,1) f32, travel_time: (B,) f32.
       Returns (mape_loss_mean, mae_loss_mean)."""
    B, S, D = token_emb.shape
    SD = S * D
    emb_flat = token_emb.reshape(B, SD)                        # free reshape

    # Per-row valid-token count + travel time, packed into one small column pair.
    lengths = jnp.count_nonzero(padding_masks, axis=1).astype(jnp.float32)  # (B,)
    tt = travel_time.astype(jnp.float32).reshape(B)
    side = jnp.stack([tt, lengths], axis=1)                    # (B, 2) f32

    w_row = jnp.tile(jnp.asarray(w, jnp.float32).reshape(1, D), (1, S))     # (1, SD)
    s_map = jnp.repeat(jnp.arange(S, dtype=jnp.float32), D).reshape(1, SD)  # (1, SD)
    b_sc = jnp.asarray(b, jnp.float32).reshape(1, 1)

    itemsize = jnp.dtype(token_emb.dtype).itemsize
    bt, vmem_limit = _pick_tile(B, SD, itemsize, tile_b)
    num_tiles = pl.cdiv(B, bt)

    cost = pl.CostEstimate(
        flops=3 * B * SD + 8 * B,
        transcendentals=0,
        bytes_accessed=(B * SD * itemsize + B * 2 * 4 + 2 * SD * 4
                        + num_tiles * 2 * 8 * 128 * 4),
    )

    mape_parts, mae_parts = pl.pallas_call(
        functools.partial(_linear_eta_kernel, batch_size=B),
        out_shape=(jax.ShapeDtypeStruct((num_tiles, 8, 128), jnp.float32),
                   jax.ShapeDtypeStruct((num_tiles, 8, 128), jnp.float32)),
        grid=(num_tiles,),
        in_specs=[
            pl.BlockSpec((bt, 2), lambda i: (i, 0)),              # [tt, len]
            pl.BlockSpec((bt, SD), lambda i: (i, 0)),             # flat embeddings
            pl.BlockSpec((1, SD), lambda i: (0, 0)),              # tiled weight row
            pl.BlockSpec((1, SD), lambda i: (0, 0)),              # token idx per col
            pl.BlockSpec(memory_space=pltpu.MemorySpace.SMEM),    # bias scalar
        ],
        out_specs=(pl.BlockSpec((1, 8, 128), lambda i: (i, 0, 0)),
                   pl.BlockSpec((1, 8, 128), lambda i: (i, 0, 0))),
        compiler_params=pltpu.CompilerParams(
            dimension_semantics=("parallel",),
            vmem_limit_bytes=vmem_limit),
        cost_estimate=cost,
    )(side, emb_flat, w_row, s_map, b_sc)

    inv_b = jnp.float32(1.0 / B)
    mape = jnp.sum(mape_parts[:, 0, 0]) * inv_b
    mae = jnp.sum(mae_parts[:, 0, 0]) * inv_b
    return mape, mae


def _reference(token_emb, padding_masks, w, b, travel_time):
    emb = token_emb.astype(jnp.float32)
    mask = padding_masks.astype(jnp.float32)[:, :, None]
    summed = jnp.sum(emb * mask, axis=1)                               # (B, D)
    w_row = jnp.asarray(w, jnp.float32).reshape(1, -1)
    eta = jnp.sum(summed * w_row, axis=1) + jnp.asarray(b, jnp.float32).reshape(())
    tt = travel_time.astype(jnp.float32)
    diff = jnp.abs(eta - tt)
    return jnp.mean(diff / (tt + 1e-9)), jnp.mean(diff)


if __name__ == "__main__":
    key = jax.random.PRNGKey(0)
    k_emb, k_w, k_b, k_tt = jax.random.split(key, 4)

    # Shared Linear(d_model=32, 1) parameters.
    D, S = 32, 8
    w = jax.random.normal(k_w, (D, 1), dtype=jnp.float32) / jnp.sqrt(jnp.float32(D))
    b = jax.random.normal(k_b, (1, 1), dtype=jnp.float32) * 0.01

    # --- check 1: small f32 case, single batch tile (B=2) ---
    B = 2
    token_emb = jax.random.normal(k_emb, (B, S, D), dtype=jnp.float32)
    lens = jnp.array([S, S // 2], dtype=jnp.int32)
    padding_masks = jnp.arange(S)[None, :] < lens[:, None]
    travel_time = jax.random.uniform(k_tt, (B,), dtype=jnp.float32,
                                     minval=60.0, maxval=600.0)

    mape, mae = linear_eta_forward(token_emb, padding_masks, w, b, travel_time)
    jax.block_until_ready((mape, mae))
    r_mape, r_mae = _reference(token_emb, padding_masks, w, b, travel_time)
    assert jnp.allclose(mape, r_mape, rtol=1e-5, atol=1e-5), (mape, r_mape)
    assert jnp.allclose(mae, r_mae, rtol=1e-5, atol=1e-3), (mae, r_mae)

    # --- check 2: multi-tile grid with a remainder (B=20, tile_b=8 -> 3 tiles) ---
    B2 = 20
    k2_emb, k2_tt, k2_len = jax.random.split(jax.random.PRNGKey(1), 3)
    token_emb2 = jax.random.normal(k2_emb, (B2, S, D), dtype=jnp.float32)
    lens2 = jax.random.randint(k2_len, (B2,), 1, S + 1)
    masks2 = jnp.arange(S)[None, :] < lens2[:, None]
    tt2 = jax.random.uniform(k2_tt, (B2,), dtype=jnp.float32, minval=60.0, maxval=600.0)

    mape2, mae2 = linear_eta_forward(token_emb2, masks2, w, b, tt2, tile_b=8)
    jax.block_until_ready((mape2, mae2))
    r_mape2, r_mae2 = _reference(token_emb2, masks2, w, b, tt2)
    assert jnp.allclose(mape2, r_mape2, rtol=1e-5, atol=1e-5), (mape2, r_mape2)
    assert jnp.allclose(mae2, r_mae2, rtol=1e-5, atol=1e-3), (mae2, r_mae2)

    # --- check 3: bf16 embeddings straight into the kernel (f32 accumulation,
    #     weight stays f32, so this should track the f32 reference closely) ---
    emb_bf16 = token_emb2.astype(jnp.bfloat16)
    mape3, mae3 = linear_eta_forward(emb_bf16, masks2, w, b, tt2, tile_b=8)
    jax.block_until_ready((mape3, mae3))
    r_mape3, r_mae3 = _reference(emb_bf16, masks2, w, b, tt2)
    assert jnp.allclose(mape3, r_mape3, rtol=1e-4, atol=1e-4), (mape3, r_mape3)
    assert jnp.allclose(mae3, r_mae3, rtol=1e-4, atol=1e-2), (mae3, r_mae3)

    # --- check 4: auto tile sizing path (no tile_b) on a bigger batch ---
    mape4, mae4 = linear_eta_forward(token_emb2, masks2, w, b, tt2)
    jax.block_until_ready((mape4, mae4))
    assert jnp.allclose(mape4, r_mape2, rtol=1e-5, atol=1e-5), (mape4, r_mape2)
    assert jnp.allclose(mae4, r_mae2, rtol=1e-5, atol=1e-3), (mae4, r_mae2)

    print("KERNEL_OK")
</pallas_src>

<mosaic_0001>
module attributes {stable_mosaic.version = 11 : i64} {
  func.func @_linear_eta_kernel(%arg0: i32, %arg1: memref<2x2xf32, #tpu.memory_space<vmem>>, %arg2: memref<2x256xf32, #tpu.memory_space<vmem>>, %arg3: memref<1x256xf32, #tpu.memory_space<vmem>>, %arg4: memref<1x256xf32, #tpu.memory_space<vmem>>, %arg5: memref<1x1xf32, #tpu.memory_space<smem>>, %arg6: memref<1x8x128xf32, #tpu.memory_space<vmem>>, %arg7: memref<1x8x128xf32, #tpu.memory_space<vmem>>) attributes {dimension_semantics = [#tpu.dimension_semantics<parallel>], iteration_bounds = array<i64: 1>, scalar_prefetch = 0 : i64, scratch_operands = 0 : i64, tpu.core_type = #tpu.core_type<tc>, window_params = [{transform_indices = @transform_0, window_bounds = array<i64: 2, 2>}, {transform_indices = @transform_1, window_bounds = array<i64: 2, 256>}, {pipeline_mode = #tpu.pipeline_mode<synchronous>, transform_indices = @transform_2, window_bounds = array<i64: 1, 256>}, {pipeline_mode = #tpu.pipeline_mode<synchronous>, transform_indices = @transform_3, window_bounds = array<i64: 1, 256>}, {transform_indices = @transform_4, window_bounds = array<i64: 1, 1>}, {transform_indices = @transform_5, window_bounds = array<i64: 1, 8, 128>}, {transform_indices = @transform_6, window_bounds = array<i64: 1, 8, 128>}]} {
    %c0 = arith.constant 0 : index
    %c0_0 = arith.constant 0 : index
    %0 = vector.load %arg2[%c0, %c0_0] : memref<2x256xf32, #tpu.memory_space<vmem>>, vector<2x256xf32>
    %c0_1 = arith.constant 0 : index
    %c0_2 = arith.constant 0 : index
    %1 = vector.load %arg1[%c0_1, %c0_2] : memref<2x2xf32, #tpu.memory_space<vmem>>, vector<2x1xf32>
    %c0_3 = arith.constant 0 : index
    %c1 = arith.constant 1 : index
    %2 = vector.load %arg1[%c0_3, %c1] : memref<2x2xf32, #tpu.memory_space<vmem>>, vector<2x1xf32>
    %c0_4 = arith.constant 0 : index
    %c0_5 = arith.constant 0 : index
    %3 = vector.load %arg4[%c0_4, %c0_5] : memref<1x256xf32, #tpu.memory_space<vmem>>, vector<1x256xf32>
    %4 = vector.broadcast %3 : vector<1x256xf32> to vector<2x256xf32>
    %5 = vector.broadcast %2 : vector<2x1xf32> to vector<2x256xf32>
    %6 = arith.cmpf olt, %4, %5 : vector<2x256xf32>
    %c0_6 = arith.constant 0 : index
    %c0_7 = arith.constant 0 : index
    %7 = vector.load %arg3[%c0_6, %c0_7] : memref<1x256xf32, #tpu.memory_space<vmem>>, vector<1x256xf32>
    %cst = arith.constant 0.000000e+00 : f32
    %8 = vector.shape_cast %7 : vector<1x256xf32> to vector<1x256xf32>
    %9 = vector.broadcast %8 : vector<1x256xf32> to vector<2x256xf32>
    %10 = vector.broadcast %cst : f32 to vector<2x256xf32>
    %11 = arith.select %6, %9, %10 : vector<2x256xi1>, vector<2x256xf32>
    %12 = arith.mulf %0, %11 : vector<2x256xf32>
    %cst_8 = arith.constant dense<0.000000e+00> : vector<2xf32>
    %13 = vector.multi_reduction <add>, %12, %cst_8 [1] : vector<2x256xf32> to vector<2xf32>
    %14 = vector.shape_cast %13 : vector<2xf32> to vector<2x1xf32>
    %c0_9 = arith.constant 0 : index
    %c0_10 = arith.constant 0 : index
    %15 = memref.load %arg5[%c0_9, %c0_10] : memref<1x1xf32, #tpu.memory_space<smem>>
    %16 = vector.broadcast %15 : f32 to vector<2x1xf32>
    %17 = arith.addf %14, %16 : vector<2x1xf32>
    %18 = arith.subf %17, %1 : vector<2x1xf32>
    %19 = math.absf %18 : vector<2x1xf32>
    %c2_i32 = arith.constant 2 : i32
    %20 = arith.muli %arg0, %c2_i32 : i32
    %21 = tpu.iota {dimensions = array<i32: 0>} : vector<2x1xi32>
    %22 = vector.broadcast %20 : i32 to vector<2x1xi32>
    %23 = arith.addi %22, %21 : vector<2x1xi32>
    %c2_i32_11 = arith.constant 2 : i32
    %24 = vector.broadcast %c2_i32_11 : i32 to vector<2x1xi32>
    %25 = arith.cmpi slt, %23, %24 : vector<2x1xi32>
    %cst_12 = arith.constant 9.99999971E-10 : f32
    %26 = vector.broadcast %cst_12 : f32 to vector<2x1xf32>
    %27 = arith.addf %1, %26 : vector<2x1xf32>
    %28 = arith.divf %19, %27 : vector<2x1xf32>
    %cst_13 = arith.constant 0.000000e+00 : f32
    %29 = vector.broadcast %cst_13 : f32 to vector<2x1xf32>
    %30 = arith.select %25, %28, %29 : vector<2x1xi1>, vector<2x1xf32>
    %31 = vector.shape_cast %30 : vector<2x1xf32> to vector<1x2x1xf32>
    %cst_14 = arith.constant dense<0.000000e+00> : vector<1xf32>
    %32 = vector.multi_reduction <add>, %31, %cst_14 [1, 2] : vector<1x2x1xf32> to vector<1xf32>
    %33 = vector.shape_cast %32 : vector<1xf32> to vector<1x1x1xf32>
    %34 = vector.extract %33[0, 0, 0] : f32 from vector<1x1x1xf32>
    %cst_15 = arith.constant 0.000000e+00 : f32
    %35 = vector.broadcast %cst_15 : f32 to vector<2x1xf32>
    %36 = arith.select %25, %19, %35 : vector<2x1xi1>, vector<2x1xf32>
    %37 = vector.shape_cast %36 : vector<2x1xf32> to vector<1x2x1xf32>
    %cst_16 = arith.constant dense<0.000000e+00> : vector<1xf32>
    %38 = vector.multi_reduction <add>, %37, %cst_16 [1, 2] : vector<1x2x1xf32> to vector<1xf32>
    %39 = vector.shape_cast %38 : vector<1xf32> to vector<1x1x1xf32>
    %40 = vector.extract %39[0, 0, 0] : f32 from vector<1x1x1xf32>
    %41 = vector.broadcast %34 : f32 to vector<1x8x128xf32>
    %c0_17 = arith.constant 0 : index
    %c0_18 = arith.constant 0 : index
    %c0_19 = arith.constant 0 : index
    %42 = vector.load %arg6[%c0_17, %c0_18, %c0_19] : memref<1x8x128xf32, #tpu.memory_space<vmem>>, vector<1x8x128xf32>
    tpu.vector_store %arg6[%c0_17, %c0_18, %c0_19], %41 {strides = array<i32>} : memref<1x8x128xf32, #tpu.memory_space<vmem>>, vector<1x8x128xf32>,
    %43 = vector.broadcast %40 : f32 to vector<1x8x128xf32>
    %c0_20 = arith.constant 0 : index
    %c0_21 = arith.constant 0 : index
    %c0_22 = arith.constant 0 : index
    %44 = vector.load %arg7[%c0_20, %c0_21, %c0_22] : memref<1x8x128xf32, #tpu.memory_space<vmem>>, vector<1x8x128xf32>
    tpu.vector_store %arg7[%c0_20, %c0_21, %c0_22], %43 {strides = array<i32>} : memref<1x8x128xf32, #tpu.memory_space<vmem>>, vector<1x8x128xf32>,
    return
  }
  func.func @transform_0(%arg0: i32) -> (i32, i32) {
    %c0_i32 = arith.constant 0 : i32
    %c0_i32_0 = arith.constant 0 : i32
    return %arg0, %c0_i32 : i32, i32
  }
  func.func @transform_1(%arg0: i32) -> (i32, i32) {
    %c0_i32 = arith.constant 0 : i32
    %c0_i32_0 = arith.constant 0 : i32
    return %arg0, %c0_i32 : i32, i32
  }
  func.func @transform_2(%arg0: i32) -> (i32, i32) {
    %c0_i32 = arith.constant 0 : i32
    %c0_i32_0 = arith.constant 0 : i32
    %c0_i32_1 = arith.constant 0 : i32
    return %c0_i32, %c0_i32_0 : i32, i32
  }
  func.func @transform_3(%arg0: i32) -> (i32, i32) {
    %c0_i32 = arith.constant 0 : i32
    %c0_i32_0 = arith.constant 0 : i32
    %c0_i32_1 = arith.constant 0 : i32
    return %c0_i32, %c0_i32_0 : i32, i32
  }
  func.func @transform_4(%arg0: i32) -> (i32, i32) {
    %c0_i32 = arith.constant 0 : i32
    %c0_i32_0 = arith.constant 0 : i32
    %c0_i32_1 = arith.constant 0 : i32
    return %c0_i32, %c0_i32_0 : i32, i32
  }
  func.func @transform_5(%arg0: i32) -> (i32, i32, i32) {
    %c0_i32 = arith.constant 0 : i32
    %c0_i32_0 = arith.constant 0 : i32
    %c0_i32_1 = arith.constant 0 : i32
    return %arg0, %c0_i32, %c0_i32_0 : i32, i32, i32
  }
  func.func @transform_6(%arg0: i32) -> (i32, i32, i32) {
    %c0_i32 = arith.constant 0 : i32
    %c0_i32_0 = arith.constant 0 : i32
    %c0_i32_1 = arith.constant 0 : i32
    return %arg0, %c0_i32, %c0_i32_0 : i32, i32, i32
  }
}

</mosaic_0001>

<bundles_post_ra>
// kernel: tpu_custom_call.1
= control target key start
LH: loop header
LB: loop body
LE: loop exit
PB: predicated region body
PF: predicated region fallthrough
CT: control target
= control target key end

     0   :  { %13 = vsyncpa [#allocation4], 0  ;;  %v217_v1 = vmov 1   ;;  %s295_s0 = inlined_call_operand.vmem [shape: f32[2,2], index: 0, kind: input, shape index: {}]   ;;  %s296_s1 = inlined_call_operand.vmem [shape: f32[2,256], index: 1, kind: input, shape index: {}]   ;;  %s297_s2 = inlined_call_operand.vmem [shape: f32[1,256], index: 2, kind: input, shape index: {}]   ;;  %s298_s3 = inlined_call_operand.vmem [shape: f32[1,256], index: 3, kind: input, shape index: {}]   ;;  %s299_s4 = inlined_call_operand.<no memory space> [shape: f32[1,1], index: 4, kind: input, shape index: {}]   ;;  %s300_s5 = inlined_call_operand.hbm [shape: f32[1,8,128], index: 5, kind: output, shape index: {0}]   ;;  %s301_s6 = inlined_call_operand.hbm [shape: f32[1,8,128], index: 6, kind: output, shape index: {1}]  }
   0x1   :  { %v26_v0 = vld [vmem:[%s295_s0] sm:$0x3]  ;;  %166 = vset.pattern.permute.xlu0 %v217_v1 }
   0x2   :  { %41 = vperm.xlu0 %166, %v26_v0  }
   0x3   :  { %14 = vsyncpa [#allocation6], 0  ;;  %v29_v2 = vlaneseq  ;;  %v218_v6 = vmov 1983009808   ;;  %v27_v8 = vld [vmem:[%s298_s3] sm:$0x3]  ;;  %v90_v29 = vstv %s299_s4 }
   0x4   :  { %v64_v7 = vunpack.c.l.s4 %v218_v6  ;;  %v46_v9 = vld [vmem:[%s297_s2] sm:$0x3]  ;;  %vm83_vm2 = vcmask 1041408   ;;  %v100_v28 = vadd.f32 1e-09, %v26_v0  ;;  %vm104_vm4 = vcmask 1024  }
   0x5   :  { %v30_v3 = vshrl.u32 %v29_v2, 7  ;;  %v25_v20 = vld [vmem:[%s296_s1] sm:$0xf]  ;;  %s219_s1 = smov [#allocation3]   ;;  %s220_s29 = smov [#allocation5]  }
   0x6   :  { %v65_v12 = vunpack.c.0.s8 %v64_v7  ;;  %167 = vrcp.f32 %v100_v28  ;;  %s136_s4 = sshll.u32 %s219_s1, 4  ;;  %s146_s30 = sshll.u32 %s220_s29, 4  ;;  %s137_s4 = int_to_ptr.vmem [resolvable:$true] %s136_s4  ;;  %s147_s30 = int_to_ptr.vmem [resolvable:$true] %s146_s30 }
   0x7   :  { %v31_v4 = vsub.s32 0, %v30_v3  ;;  %v35_v5 = vsub.s32 1, %v30_v3  ;;  %vm99_vm3 = vcmp.lt.s32.totalorder %v30_v3, 2  ;;  %s169_s7 = scalar_lea.vmem %s137_s4, 128  ;;  %p174_p1 = scmp.lt.s32.totalorder %s137_s4, %s137_s4 }
   0x8   :  { %v68_v16 = vsub.s32 %v65_v12, %v30_v3  ;;  %p170_p0 = scmp.ne.s32.totalorder %s137_s4, %s169_s7  ;;  %p175_p2 = scmp.lt.s32.totalorder %s169_s7, %s169_s7 }
   0x9   :  { %v32_v10 = vrot.slane %v27_v8, %v31_v4  ;;  %v36_v11 = vrot.slane %v27_v8, %v35_v5  ;;  %v51_v13 = vrot.slane %v46_v9, %v31_v4  ;;  %v55_v14 = vrot.slane %v46_v9, %v35_v5 }
   0xa   :  { %p176_p3 = por %p175_p2, %p174_p1 }
   0xc   :  { %p177_p4 = pnand %p176_p3, %p170_p0 }
  0x10   :  { %v168_v33 = vpop.eup %167 }
  0x81   :  { %v42_v15 = vpop.permute.xlu0 %41 }
  0x82   :  { %vm44_vm0 = vcmp.lt.f32.partialorder %v32_v10, %v42_v15  ;;  %vm45_vm1 = vcmp.lt.f32.partialorder %v36_v11, %v42_v15 }
  0x83   :  { %v58_v17 = vsel %vm44_vm0, %v51_v13, 0.0  ;;  %v59_v18 = vsel %vm45_vm1, %v55_v14, 0.0 }
  0x84   :  { %v62_v19 = vcombine.low %v58_v17, %v59_v18 }
  0x86   :  { %v69_v21 = vrot.slane %v62_v19, %v68_v16 }
  0x88   :  { %v71_v22 = vmul.f32 %v69_v21, %v25_v20 }
  0x8a   :  { %v79_v23 = vrot.slane %v71_v22, %v68_v16 }
  0x8c   :  { %v80_v24 = vcombine.high %v79_v23, %v79_v23  ;;  %v84_v25 = vsel %vm83_vm2, %v79_v23, 0.0 }
  0x8e   :  { %v85_v26 = vsel %vm83_vm2, %v80_v24, 0.0 }
  0x8f   :  { %v86_v27 = vadd.f32 %v85_v26, %v84_v25 }
  0x91   :  { %87 = vadd.xlane.f32.xlu0 %v86_v27 }
 0x11e   :  { %v88_v30 = vpop.xlane.xlu0 %87 }
 0x11f   :  { %v91_v31 = vadd.f32 %v90_v29, %v88_v30 }
 0x121   :  { %v92_v32 = vsub.f32 %v91_v31, %v26_v0 }
 0x123   :  { %v93_v34 = vand.u32 2147483647, %v92_v32 }
 0x125   :  { %v102_v35 = vmul.f32 %v168_v33, %v93_v34  ;;  %v115_v38 = vsel %vm99_vm3, %v93_v34, 0.0 }
 0x126   :  { %v116_v39 = vsel %vm104_vm4, %v115_v38, 0.0 }
 0x127   :  { %v103_v36 = vsel %vm99_vm3, %v102_v35, 0.0 }
 0x128   :  { %v105_v37 = vsel %vm104_vm4, %v103_v36, 0.0 }
 0x129   :  { %106 = vadd.xlane.f32.xlu1 %v105_v37 }
 0x12d   :  { %117 = vadd.xlane.f32.xlu1 %v116_v39 }
 0x1b6   :  { %v107_v40 = vpop.xlane.xlu1 %106 }
 0x1b7   :  { %v108_v41 = vrot.slane %v107_v40, 4 }
 0x1b9   :  { %v109_v42 = vadd.f32 %v108_v41, %v107_v40 }
 0x1ba   :  { %v118_v43 = vpop.xlane.xlu1 %117 }
 0x1bb   :  { %v110_v44 = vrot.slane %v109_v42, 2  ;;  %v119_v45 = vrot.slane %v118_v43, 4 }
 0x1bd   :  { %v120_v46 = vadd.f32 %v119_v45, %v118_v43  ;;  %v111_v47 = vadd.f32 %v110_v44, %v109_v42 }
 0x1bf   :  { %v121_v48 = vrot.slane %v120_v46, 2  ;;  %v112_v49 = vrot.slane %v111_v47, 1 }
 0x1c1   :  { %v122_v50 = vadd.f32 %v121_v48, %v120_v46  ;;  %v113_v51 = vadd.f32 %v112_v49, %v111_v47 }
 0x1c3   :  { %158 = vpush %v113_v51  ;;  %v123_v52 = vrot.slane %v122_v50, 1 }
 0x1c5   :  { %v124_v53 = vadd.f32 %v123_v52, %v122_v50 }
 0x1c7   :  { %160 = vpush %v124_v53 }
 0x1f4   :  { %s159_s28 = spop %158 }
 0x1f5   :  { %v126_v54 = vstv %s159_s28 }
 0x1f6   :  { %127 = vst [vmem:[#allocation3] sm:$0xff] %v126_v54 }
 0x1f7   :  { %180 = shalt.err (!%p177_p4)
}
 0x1f8   :  { %s181_s10 = scalar_lea.hbm %s300_s5, 128 }
 0x1f9   :  { %p182_p5 = scmp.ne.s32.totalorder %s300_s5, %s181_s10  ;;  %p185_p6 = scmp.lt.u32.totalorder %s181_s10, %s300_s5 }
 0x1fb   :  { %p187_p7 = pnand %p185_p6, %p182_p5 }
 0x1fd   :  { %190 = shalt.err (!%p187_p7)
}
 0x1fe   :  { %139 = dma.vmem_to_hbm [thread:$0]  %s137_s4, 128, %s300_s5, [#allocation4]  }
 0x1ff   :  { %s161_s17 = spop %160  ;;  %s191_s18 = scalar_lea.vmem %s147_s30, 128 }
 0x200   :  { %v128_v55 = vstv %s161_s17  ;;  %p192_p8 = scmp.ne.s32.totalorder %s147_s30, %s191_s18  ;;  %p196_p9 = scmp.lt.s32.totalorder %s147_s30, %s147_s30 }
 0x201   :  { %129 = vst [vmem:[#allocation5] sm:$0xff] %v128_v55  ;;  %p197_p10 = scmp.lt.s32.totalorder %s191_s18, %s191_s18 }
 0x203   :  { %p198_p11 = por %p197_p10, %p196_p9 }
 0x205   :  { %p199_p12 = pnand %p198_p11, %p192_p8 }
 0x207   :  { %202 = shalt.err (!%p199_p12)
}
 0x208   :  { %s203_s21 = scalar_lea.hbm %s301_s6, 128 }
 0x209   :  { %p204_p13 = scmp.ne.s32.totalorder %s301_s6, %s203_s21  ;;  %p207_p0 = scmp.lt.u32.totalorder %s203_s21, %s301_s6 }
 0x20b   :  { %p209_p1 = pnand %p207_p0, %p204_p13 }
 0x20d   :  { %212 = shalt.err (!%p209_p1)
}
 0x20e   :  { %149 = dma.vmem_to_hbm [thread:$0]  %s147_s30, 128, %s301_s6, [#allocation6]  }
 0x20f   :  { %213 = dma.done.wait [#allocation4], 128  }
 0x210   :  { %214 = vsyncadd [#allocation4], 4294967168 }
 0x211   :  { %215 = dma.done.wait [#allocation6], 128  }
 0x212   :  { %216 = vsyncadd [#allocation6], 4294967168 }
 0x213   :  { %156 = vsyncpa [#allocation4], 1 }
 0x214   :  { %157 = vsyncpa [#allocation6], 1 }

</bundles_post_ra>
